<compile_context>
chip_gen: v6e
topology: v6e:2x2x1
jax: 0.10.0
libtpu: 0.0.40
codegen_flags: <defaults>
</compile_context>

<pallas_src>
import numpy as np
import jax
import jax.numpy as jnp
from jax import lax
from jax.experimental import pallas as pl
from jax.experimental.pallas import tpu as pltpu

LN2 = float(np.log(2.0))
_VMEM = pl.BlockSpec(memory_space=pltpu.MemorySpace.VMEM)


# ----------------------------- Pallas kernels -------------------------------

def make_pair_energy_kernel(B, A, N, Ob, shift_per_atom):
    """Fused band-padded pair projection + in-kernel pairagg mean + atom_net energy."""
    BA = B * A
    P = BA * N

    def kernel(v_ref, wf_ref, bf_ref, x_ref, pk_ref,
               hoff_ref, hon_ref, soff_ref, e_ref):
        # --- one lane-dense MXU matmul covering all three Dense heads.
        #     bf16 cast happens here (VPU), not in XLA glue.
        v16 = v_ref[...].astype(jnp.bfloat16)
        rows = jnp.dot(v16, wf_ref[...],
                       preferred_element_type=jnp.float32) + bf_ref[...]   # (P, 3*Ob)

        # lane-aligned band slices -> separate lane-dense outputs
        hoff_ref[...] = rows[:, 0:Ob]
        soff_ref[...] = rows[:, 2 * Ob:3 * Ob]

        # pairagg (mean over neighbors) for the onsite band, done in-kernel via an
        # iota-built selection matmul (avoids reshapes and an extra HBM round trip).
        r_idx = lax.broadcasted_iota(jnp.int32, (BA, P), 0)
        c_idx = lax.broadcasted_iota(jnp.int32, (BA, P), 1)
        msel = ((c_idx >= r_idx * N) & (c_idx < (r_idx + 1) * N)).astype(jnp.float32)
        hon_ref[...] = jnp.dot(msel, rows[:, Ob:2 * Ob],
                               preferred_element_type=jnp.float32) * (1.0 / N)

        # --- atom_net: Dense -> shifted softplus -> Dense (stddev folded into W2) ->
        #     ScaleShift (b2*stddev+mean folded into a constant) -> per-sample atom sum.
        pk = pk_ref[...]                               # packed [W1; b1; (W2*stddev)^T]
        F1 = x_ref.shape[-1]
        w1 = pk[0:F1, :]
        b1 = pk[F1:F1 + 1, :]
        w2s = pk[F1 + 1:F1 + 2, :]                     # (1, H1)
        h = jnp.dot(x_ref[...], w1, preferred_element_type=jnp.float32) + b1
        h = jnp.maximum(h, 0.0) + jnp.log1p(jnp.exp(-jnp.abs(h))) - LN2
        contrib = h * w2s                              # (BA, H1) per-atom contributions
        b_idx = lax.broadcasted_iota(jnp.int32, (B, BA), 0)
        a_idx = lax.broadcasted_iota(jnp.int32, (B, BA), 1)
        bsel = ((a_idx >= b_idx * A) & (a_idx < (b_idx + 1) * A)).astype(jnp.float32)
        per_sample = jnp.dot(bsel, contrib, preferred_element_type=jnp.float32)  # (B,H1)
        e_ref[...] = (jnp.sum(per_sample, axis=-1, keepdims=True)
                      + A * shift_per_atom)            # ONE whole-tile (B, 1) store

    return kernel


def sym_diag_kernel(mh_ref, ms_ref, dh_ref, ds_ref, h_ref, s_ref):
    """0.5*(M + M^T) + h0/s0 on the diagonal via a select (no dense eye multiply)."""
    Dp = h_ref.shape[-1]
    row = lax.broadcasted_iota(jnp.int32, (Dp, Dp), 0)
    col = lax.broadcasted_iota(jnp.int32, (Dp, Dp), 1)
    diag = row == col
    mh = mh_ref[0]                                     # (Dp, Dp) for the current sample
    ms = ms_ref[0]
    symh = 0.5 * (mh + mh.T)
    syms = 0.5 * (ms + ms.T)
    h_ref[0] = jnp.where(diag, symh + dh_ref[0], symh)
    s_ref[0] = jnp.where(diag, syms + ds_ref[0], syms)


# ------------------------------- wrappers ------------------------------------

def _pair_energy(Vb, Wf, bf, x2, pk, B, A, N, Ob, shift_per_atom):
    P = Vb.shape[0]
    BA = B * A
    return pl.pallas_call(
        make_pair_energy_kernel(B, A, N, Ob, shift_per_atom),
        in_specs=[_VMEM] * 5,
        out_specs=(_VMEM,) * 4,
        out_shape=(jax.ShapeDtypeStruct((P, Ob), jnp.float32),    # H_off band
                   jax.ShapeDtypeStruct((BA, Ob), jnp.float32),   # H_on (neighbor mean)
                   jax.ShapeDtypeStruct((P, Ob), jnp.float32),    # S_off band
                   jax.ShapeDtypeStruct((B, 1), jnp.float32)),    # per-sample energy
    )(Vb, Wf, bf, x2, pk)


def _sym_diag(Mh_p, Ms_p, dh_p, ds_p):
    B, Dp, _ = Mh_p.shape
    mat_spec = pl.BlockSpec((1, Dp, Dp), lambda b: (b, 0, 0))
    vec_spec = pl.BlockSpec((1, 1, Dp), lambda b: (b, 0, 0))
    return pl.pallas_call(
        sym_diag_kernel,
        grid=(B,),
        in_specs=[mat_spec, mat_spec, vec_spec, vec_spec],
        out_specs=(mat_spec, mat_spec),
        out_shape=(jax.ShapeDtypeStruct((B, Dp, Dp), jnp.float32),
                   jax.ShapeDtypeStruct((B, Dp, Dp), jnp.float32)),
        compiler_params=pltpu.CompilerParams(dimension_semantics=("parallel",)),
    )(Mh_p, Ms_p, dh_p, ds_p)


# --------------------------- one-time parameter prep -------------------------

def prepare_params(params):
    """Hoisted out of the forward: band concat/pad/bf16 cast + atom_net packing."""
    no = params["basis_definition"].shape[1]
    no2 = no * no
    Ob = ((no2 + 127) // 128) * 128                    # per-head lane band width

    def bandW(W):
        return jnp.pad(W, ((0, 0), (0, Ob - no2)))

    def bandb(b):
        return jnp.pad(b, ((0, 0), (0, Ob - no2)))

    Wf = jnp.concatenate([bandW(params["W_off"]), bandW(params["W_on"]),
                          bandW(params["W_ov"])], axis=1).astype(jnp.bfloat16)
    bf = jnp.concatenate([bandb(params["b_off"]), bandb(params["b_on"]),
                          bandb(params["b_ov"])], axis=1).astype(jnp.float32)

    stddev = float(params["stddev"])
    mean = float(params["mean"])
    w2s = (params["W2"] * stddev).T                    # (1, H1), stddev folded in
    pk = jnp.concatenate([params["W1"], params["b1"], w2s], axis=0).astype(jnp.float32)
    shift_per_atom = float(np.asarray(params["b2"]).reshape(-1)[0]) * stddev + mean

    return {
        "Wf": Wf, "bf": bf, "pk": pk, "shift_per_atom": shift_per_atom,
        "Ob": Ob, "no": no, "no2": no2,
        "basis_definition": params["basis_definition"],
        "orbital_energies": params["orbital_energies"],
        "emb_weight": params["emb_weight"],
    }


# --------------------------------- forward ------------------------------------

def hamiltonian_forward(prep, Z, nbh, Vijkl, x, active_idx):
    B, A = Z.shape
    N = nbh.shape[2]
    no, no2, Ob = prep["no"], prep["no2"], prep["Ob"]
    F_in = int(np.prod(Vijkl.shape[3:]))
    D = A * no
    Dp = ((D + 127) // 128) * 128

    Vb = Vijkl.reshape(B * A * N, F_in)                # stays f32; bf16 cast is in-kernel
    x2 = x.reshape(B * A, -1)

    hoff, hon, soff, E = _pair_energy(Vb, prep["Wf"], prep["bf"], x2, prep["pk"],
                                      B, A, N, Ob, prep["shift_per_atom"])

    # lane-offset-0 (aligned) narrowing slices of the per-head bands
    H_off = hoff[:, :no2].reshape(B, A, N, no2)
    H_on = hon[:, :no2].reshape(B, A, no2)
    S_off = soff[:, :no2].reshape(B, A, N, no2)

    # --- neighbor re-sort + gather (exactly mirrors the torch code) -------- glue
    ar = jnp.broadcast_to(jnp.arange(A, dtype=nbh.dtype)[None, :, None], (B, A, 1))
    order = jnp.argsort(jnp.concatenate([nbh, ar], axis=2), axis=2)      # (B, A, A)
    zeros = jnp.zeros((B, A, 1, no2), jnp.float32)

    def gather(off):
        return jnp.take_along_axis(jnp.concatenate([off, zeros], axis=2),
                                   order[..., None], axis=2)             # (B, A, A, no2)

    H_off_full = gather(H_off)
    S_off_full = gather(S_off)

    # onsite overlap: zero-initialized embedding (per the module's __init__)
    S_on = prep["emb_weight"][Z]                                         # (B, A, no2)

    # blocks -> un-symmetrized big matrix (layout permute), zero-padded to Dp -- glue
    eyeA = jnp.eye(A, dtype=jnp.float32)[None, :, :, None]

    def big(off_full, on):
        blk = off_full + eyeA * on[:, :, None, :]
        M = blk.reshape(B, A, A, no, no).transpose(0, 1, 3, 2, 4).reshape(B, D, D)
        return jnp.pad(M, ((0, 0), (0, Dp - D), (0, Dp - D)))

    # h0 / s0 diagonal vectors (masked to active orbitals), zero-padded to Dp
    bd = prep["basis_definition"]
    mask = (bd[Z, :, 2] > 0).astype(jnp.float32)                         # (B, A, no)
    h0 = (prep["orbital_energies"][Z] * mask).reshape(B, D)
    s0 = mask.reshape(B, D)                                              # s0 energies == 1
    dh = jnp.pad(h0, ((0, 0), (0, Dp - D)))[:, None, :]                  # (B, 1, Dp)
    ds = jnp.pad(s0, ((0, 0), (0, Dp - D)))[:, None, :]

    H_big, S_big = _sym_diag(big(H_off_full, H_on), big(S_off_full, S_on), dh, ds)

    # masked_select (data-dependent size) -> static host-side index plan ---- glue
    # TODO(synk): torch.masked_select has a data-dependent output size; we use a
    #             precomputed static index plan (same active count per sample).
    bi = jnp.arange(B)[:, None, None]
    H = H_big[bi, active_idx[:, :, None], active_idx[:, None, :]]
    S = S_big[bi, active_idx[:, :, None], active_idx[:, None, :]]

    return {"hamiltonian": H, "overlap": S, "energy": E, "forces": None}


# ----------------------------- pure-JAX reference ----------------------------

def reference_forward(params, Z, nbh, Vijkl, x, active_idx):
    B, A = Z.shape
    bd = params["basis_definition"]
    no = bd.shape[1]
    no2 = no * no
    V = Vijkl.reshape(B, A, nbh.shape[2], -1).astype(jnp.float32)

    H_off = jnp.einsum("banf,fo->bano", V, params["W_off"]) + params["b_off"][0]
    H_on = jnp.einsum("banf,fo->bano", V, params["W_on"]) + params["b_on"][0]
    H_on = jnp.mean(H_on, axis=2)
    S_off = jnp.einsum("banf,fo->bano", V, params["W_ov"]) + params["b_ov"][0]

    ar = jnp.broadcast_to(jnp.arange(A, dtype=nbh.dtype)[None, :, None], (B, A, 1))
    order = jnp.argsort(jnp.concatenate([nbh, ar], axis=2), axis=2)
    zeros = jnp.zeros((B, A, 1, no2), jnp.float32)

    def gather(off):
        return jnp.take_along_axis(jnp.concatenate([off, zeros], axis=2),
                                   order[..., None], axis=2)

    H_offg, S_offg = gather(H_off), gather(S_off)
    S_on = params["emb_weight"][Z]
    eyeA = jnp.eye(A, dtype=jnp.float32)[None, :, :, None]

    def build(offg, on):
        M = offg + eyeA * on[:, :, None, :]
        M = M.reshape(B, A, A, no, no).transpose(0, 1, 3, 2, 4).reshape(B, A * no, A * no)
        return 0.5 * (M + jnp.transpose(M, (0, 2, 1)))

    Hbig, Sbig = build(H_offg, H_on), build(S_offg, S_on)

    bi = jnp.arange(B)[:, None, None]
    Hs = Hbig[bi, active_idx[:, :, None], active_idx[:, None, :]]
    Ss = Sbig[bi, active_idx[:, :, None], active_idx[:, None, :]]

    mask = (bd[Z, :, 2] > 0).astype(jnp.float32)
    h0_full = (params["orbital_energies"][Z] * mask).reshape(B, A * no)
    s0_full = mask.reshape(B, A * no)
    h0_sel = jnp.take_along_axis(h0_full, active_idx, axis=1)
    s0_sel = jnp.take_along_axis(s0_full, active_idx, axis=1)
    orbs = active_idx.shape[1]
    eye_o = jnp.eye(orbs, dtype=jnp.float32)[None]
    Hs = Hs + eye_o * h0_sel[:, None, :]
    Ss = Ss + eye_o * s0_sel[:, None, :]

    h = jax.nn.softplus(x @ params["W1"] + params["b1"][0]) - LN2
    e = h @ params["W2"] + params["b2"][0]
    e = e * params["stddev"] + params["mean"]
    E = jnp.sum(e, axis=1)
    return {"hamiltonian": Hs, "overlap": Ss, "energy": E, "forces": None}


# ---------------------------------- main -------------------------------------

if __name__ == "__main__":
    # Small, module-consistent configuration
    B, A = 2, 4                       # batch, max_atoms
    N = A - 1                         # neighbors per atom
    n_cos, dirs, lmax = 32, 3, 1
    F_in = n_cos * dirs * (2 * lmax + 1)      # 288
    n_types, n_orbs = 10, 5
    no2 = n_orbs * n_orbs
    max_z = 10
    mean, stddev = -0.3, 0.7

    # basis_definition: column 2 > 0 marks active orbitals per element
    n_active = {0: 0, 1: 1, 6: 4, 7: 4, 8: 4}
    basis_def_np = np.zeros((n_types, n_orbs, 3), dtype=np.int32)
    for t in range(n_types):
        basis_def_np[t, : n_active.get(t, 2), 2] = 1

    orbital_energies_np = -(np.arange(n_types)[:, None] * 0.3
                            + np.arange(n_orbs)[None, :] * 0.1 + 0.5).astype(np.float32)

    # atoms (both samples have the same total active-orbital count -> valid masked_select)
    Z_np = np.array([[8, 1, 1, 0], [1, 1, 8, 0]], dtype=np.int32)
    nbh_np = np.broadcast_to(
        np.array([[j for j in range(A) if j != i] for i in range(A)], dtype=np.int32),
        (B, A, N)).copy()

    # static masked_select plan (host-side, from concrete Z)
    mask_np = (basis_def_np[Z_np][:, :, :, 2] > 0).reshape(B, A * n_orbs)
    counts = mask_np.sum(axis=1)
    assert np.all(counts == counts[0]), "samples must share active-orbital count"
    active_idx_np = np.stack([np.nonzero(mask_np[b])[0] for b in range(B)]).astype(np.int32)

    # deterministic parameters / inputs
    key = jax.random.PRNGKey(0)
    ks = jax.random.split(key, 12)
    params = {
        "basis_definition": jnp.asarray(basis_def_np),
        "orbital_energies": jnp.asarray(orbital_energies_np),
        "W_off": jax.random.normal(ks[0], (F_in, no2), jnp.float32) / np.sqrt(F_in),
        "b_off": jax.random.normal(ks[1], (1, no2), jnp.float32) * 0.01,
        "W_on": jax.random.normal(ks[2], (F_in, no2), jnp.float32) / np.sqrt(F_in),
        "b_on": jax.random.normal(ks[3], (1, no2), jnp.float32) * 0.01,
        "W_ov": jax.random.normal(ks[4], (F_in, no2), jnp.float32) / np.sqrt(F_in),
        "b_ov": jax.random.normal(ks[5], (1, no2), jnp.float32) * 0.01,
        "emb_weight": jnp.zeros((max_z, no2), jnp.float32),   # module zeroes this embedding
        "W1": jax.random.normal(ks[6], (n_cos, n_cos // 2), jnp.float32) / np.sqrt(n_cos),
        "b1": jax.random.normal(ks[7], (1, n_cos // 2), jnp.float32) * 0.01,
        "W2": jax.random.normal(ks[8], (n_cos // 2, 1), jnp.float32) / np.sqrt(n_cos // 2),
        "b2": jax.random.normal(ks[9], (1, 1), jnp.float32) * 0.01,
        "mean": mean, "stddev": stddev,
    }

    Vijkl = jax.random.normal(ks[10], (B, A, N, n_cos, dirs * (2 * lmax + 1)), jnp.float32)
    x = jax.random.normal(ks[11], (B, A, n_cos), jnp.float32)

    Z = jnp.asarray(Z_np)
    nbh = jnp.asarray(nbh_np)
    active_idx = jnp.asarray(active_idx_np)

    # one-time weight prep (hoisted out of the forward)
    prep = prepare_params(params)

    out = hamiltonian_forward(prep, Z, nbh, Vijkl, x, active_idx)
    out = jax.tree_util.tree_map(jax.block_until_ready,
                                 {k: v for k, v in out.items() if v is not None})

    ref = reference_forward(params, Z, nbh, Vijkl, x, active_idx)
    ok = (np.allclose(np.asarray(out["hamiltonian"]), np.asarray(ref["hamiltonian"]),
                      atol=5e-2, rtol=5e-2)
          and np.allclose(np.asarray(out["overlap"]), np.asarray(ref["overlap"]),
                          atol=5e-2, rtol=5e-2)
          and np.allclose(np.asarray(out["energy"]), np.asarray(ref["energy"]),
                          atol=5e-2, rtol=5e-2))
    if not ok:
        raise AssertionError("Pallas output does not match JAX reference")
    print("KERNEL_OK")
</pallas_src>

<mosaic_0001>
module attributes {stable_mosaic.version = 11 : i64} {
  func.func @kernel(%arg0: memref<24x288xf32, #tpu.memory_space<vmem>>, %arg1: memref<288x384xbf16, #tpu.memory_space<vmem>>, %arg2: memref<1x384xf32, #tpu.memory_space<vmem>>, %arg3: memref<8x32xf32, #tpu.memory_space<vmem>>, %arg4: memref<34x16xf32, #tpu.memory_space<vmem>>, %arg5: memref<24x128xf32, #tpu.memory_space<vmem>>, %arg6: memref<8x128xf32, #tpu.memory_space<vmem>>, %arg7: memref<24x128xf32, #tpu.memory_space<vmem>>, %arg8: memref<2x1xf32, #tpu.memory_space<vmem>>) attributes {dimension_semantics = [], scalar_prefetch = 0 : i64, scratch_operands = 0 : i64, tpu.core_type = #tpu.core_type<tc>} {
    %c0 = arith.constant 0 : index
    %c0_0 = arith.constant 0 : index
    %0 = vector.load %arg0[%c0, %c0_0] : memref<24x288xf32, #tpu.memory_space<vmem>>, vector<24x288xf32>
    %1 = arith.truncf %0 : vector<24x288xf32> to vector<24x288xbf16>
    %c0_1 = arith.constant 0 : index
    %c0_2 = arith.constant 0 : index
    %2 = vector.load %arg1[%c0_1, %c0_2] : memref<288x384xbf16, #tpu.memory_space<vmem>>, vector<288x384xbf16>
    %cst = arith.constant dense<0.000000e+00> : vector<24x384xf32>
    %3 = tpu.matmul %1, %2, %cst {dimension_numbers = #tpu.dot_dimension_numbers<[1], [0], [0], [1], [0, 0, 1, 1], [], []>} : vector<24x288xbf16>, vector<288x384xbf16>, vector<24x384xf32> -> vector<24x384xf32>
    %c0_3 = arith.constant 0 : index
    %c0_4 = arith.constant 0 : index
    %4 = vector.load %arg2[%c0_3, %c0_4] : memref<1x384xf32, #tpu.memory_space<vmem>>, vector<1x384xf32>
    %5 = vector.broadcast %4 : vector<1x384xf32> to vector<24x384xf32>
    %6 = arith.addf %3, %5 : vector<24x384xf32>
    %7 = vector.extract_strided_slice %6 {offsets = [0, 0], sizes = [24, 128], strides = [1, 1]} : vector<24x384xf32> to vector<24x128xf32>
    %c0_5 = arith.constant 0 : index
    %c0_6 = arith.constant 0 : index
    %8 = vector.load %arg5[%c0_5, %c0_6] : memref<24x128xf32, #tpu.memory_space<vmem>>, vector<24x128xf32>
    tpu.vector_store %arg5[%c0_5, %c0_6], %7 {strides = array<i32>} : memref<24x128xf32, #tpu.memory_space<vmem>>, vector<24x128xf32>,
    %9 = vector.extract_strided_slice %6 {offsets = [0, 256], sizes = [24, 128], strides = [1, 1]} : vector<24x384xf32> to vector<24x128xf32>
    %c0_7 = arith.constant 0 : index
    %c0_8 = arith.constant 0 : index
    %10 = vector.load %arg7[%c0_7, %c0_8] : memref<24x128xf32, #tpu.memory_space<vmem>>, vector<24x128xf32>
    tpu.vector_store %arg7[%c0_7, %c0_8], %9 {strides = array<i32>} : memref<24x128xf32, #tpu.memory_space<vmem>>, vector<24x128xf32>,
    %11 = tpu.iota {dimensions = array<i32: 0>} : vector<8x24xi32>
    %12 = tpu.iota {dimensions = array<i32: 1>} : vector<8x24xi32>
    %c3_i32 = arith.constant 3 : i32
    %13 = vector.broadcast %c3_i32 : i32 to vector<8x24xi32>
    %14 = arith.muli %11, %13 : vector<8x24xi32>
    %15 = arith.cmpi sge, %12, %14 : vector<8x24xi32>
    %c1_i32 = arith.constant 1 : i32
    %16 = vector.broadcast %c1_i32 : i32 to vector<8x24xi32>
    %17 = arith.addi %11, %16 : vector<8x24xi32>
    %c3_i32_9 = arith.constant 3 : i32
    %18 = vector.broadcast %c3_i32_9 : i32 to vector<8x24xi32>
    %19 = arith.muli %17, %18 : vector<8x24xi32>
    %20 = arith.cmpi slt, %12, %19 : vector<8x24xi32>
    %21 = arith.andi %15, %20 : vector<8x24xi1>
    %22 = arith.extui %21 : vector<8x24xi1> to vector<8x24xi32>
    %23 = arith.sitofp %22 : vector<8x24xi32> to vector<8x24xf32>
    %24 = vector.extract_strided_slice %6 {offsets = [0, 128], sizes = [24, 128], strides = [1, 1]} : vector<24x384xf32> to vector<24x128xf32>
    %cst_10 = arith.constant dense<0.000000e+00> : vector<8x128xf32>
    %25 = tpu.matmul %23, %24, %cst_10 {dimension_numbers = #tpu.dot_dimension_numbers<[1], [0], [0], [1], [0, 0, 1, 1], [], []>} : vector<8x24xf32>, vector<24x128xf32>, vector<8x128xf32> -> vector<8x128xf32>
    %cst_11 = arith.constant 0.333333343 : f32
    %26 = vector.broadcast %cst_11 : f32 to vector<8x128xf32>
    %27 = arith.mulf %25, %26 : vector<8x128xf32>
    %c0_12 = arith.constant 0 : index
    %c0_13 = arith.constant 0 : index
    %28 = vector.load %arg6[%c0_12, %c0_13] : memref<8x128xf32, #tpu.memory_space<vmem>>, vector<8x128xf32>
    tpu.vector_store %arg6[%c0_12, %c0_13], %27 {strides = array<i32>} : memref<8x128xf32, #tpu.memory_space<vmem>>, vector<8x128xf32>,
    %c0_14 = arith.constant 0 : index
    %c0_15 = arith.constant 0 : index
    %29 = vector.load %arg4[%c0_14, %c0_15] : memref<34x16xf32, #tpu.memory_space<vmem>>, vector<34x16xf32>
    %30 = vector.extract_strided_slice %29 {offsets = [0, 0], sizes = [32, 16], strides = [1, 1]} : vector<34x16xf32> to vector<32x16xf32>
    %31 = vector.extract_strided_slice %29 {offsets = [32, 0], sizes = [1, 16], strides = [1, 1]} : vector<34x16xf32> to vector<1x16xf32>
    %32 = vector.extract_strided_slice %29 {offsets = [33, 0], sizes = [1, 16], strides = [1, 1]} : vector<34x16xf32> to vector<1x16xf32>
    %c0_16 = arith.constant 0 : index
    %c0_17 = arith.constant 0 : index
    %33 = vector.load %arg3[%c0_16, %c0_17] : memref<8x32xf32, #tpu.memory_space<vmem>>, vector<8x32xf32>
    %cst_18 = arith.constant dense<0.000000e+00> : vector<8x16xf32>
    %34 = tpu.matmul %33, %30, %cst_18 {dimension_numbers = #tpu.dot_dimension_numbers<[1], [0], [0], [1], [0, 0, 1, 1], [], []>} : vector<8x32xf32>, vector<32x16xf32>, vector<8x16xf32> -> vector<8x16xf32>
    %35 = vector.broadcast %31 : vector<1x16xf32> to vector<8x16xf32>
    %36 = arith.addf %34, %35 : vector<8x16xf32>
    %cst_19 = arith.constant 0.000000e+00 : f32
    %37 = vector.broadcast %cst_19 : f32 to vector<8x16xf32>
    %38 = arith.maximumf %36, %37 : vector<8x16xf32>
    %39 = math.absf %36 : vector<8x16xf32>
    %cst_20 = arith.constant 0.000000e+00 : f32
    %40 = vector.broadcast %cst_20 : f32 to vector<8x16xf32>
    %41 = arith.subf %40, %39 : vector<8x16xf32>
    %42 = math.exp %41 : vector<8x16xf32>
    %43 = math.log1p %42 : vector<8x16xf32>
    %44 = arith.addf %38, %43 : vector<8x16xf32>
    %cst_21 = arith.constant 0.693147182 : f32
    %45 = vector.broadcast %cst_21 : f32 to vector<8x16xf32>
    %46 = arith.subf %44, %45 : vector<8x16xf32>
    %47 = vector.broadcast %32 : vector<1x16xf32> to vector<8x16xf32>
    %48 = arith.mulf %46, %47 : vector<8x16xf32>
    %49 = tpu.iota {dimensions = array<i32: 0>} : vector<2x8xi32>
    %50 = tpu.iota {dimensions = array<i32: 1>} : vector<2x8xi32>
    %c4_i32 = arith.constant 4 : i32
    %51 = vector.broadcast %c4_i32 : i32 to vector<2x8xi32>
    %52 = arith.muli %49, %51 : vector<2x8xi32>
    %53 = arith.cmpi sge, %50, %52 : vector<2x8xi32>
    %c1_i32_22 = arith.constant 1 : i32
    %54 = vector.broadcast %c1_i32_22 : i32 to vector<2x8xi32>
    %55 = arith.addi %49, %54 : vector<2x8xi32>
    %c4_i32_23 = arith.constant 4 : i32
    %56 = vector.broadcast %c4_i32_23 : i32 to vector<2x8xi32>
    %57 = arith.muli %55, %56 : vector<2x8xi32>
    %58 = arith.cmpi slt, %50, %57 : vector<2x8xi32>
    %59 = arith.andi %53, %58 : vector<2x8xi1>
    %60 = arith.extui %59 : vector<2x8xi1> to vector<2x8xi32>
    %61 = arith.sitofp %60 : vector<2x8xi32> to vector<2x8xf32>
    %cst_24 = arith.constant dense<0.000000e+00> : vector<2x16xf32>
    %62 = tpu.matmul %61, %48, %cst_24 {dimension_numbers = #tpu.dot_dimension_numbers<[1], [0], [0], [1], [0, 0, 1, 1], [], []>} : vector<2x8xf32>, vector<8x16xf32>, vector<2x16xf32> -> vector<2x16xf32>
    %cst_25 = arith.constant dense<0.000000e+00> : vector<2xf32>
    %63 = vector.multi_reduction <add>, %62, %cst_25 [1] : vector<2x16xf32> to vector<2xf32>
    %64 = vector.shape_cast %63 : vector<2xf32> to vector<2x1xf32>
    %cst_26 = arith.constant -1.19798124 : f32
    %65 = vector.broadcast %cst_26 : f32 to vector<2x1xf32>
    %66 = arith.addf %64, %65 : vector<2x1xf32>
    %c0_27 = arith.constant 0 : index
    %c0_28 = arith.constant 0 : index
    %67 = vector.load %arg8[%c0_27, %c0_28] : memref<2x1xf32, #tpu.memory_space<vmem>>, vector<2x1xf32>
    tpu.vector_store %arg8[%c0_27, %c0_28], %66 {strides = array<i32>} : memref<2x1xf32, #tpu.memory_space<vmem>>, vector<2x1xf32>,
    return
  }
}

</mosaic_0001>

<bundles_post_ra>
// kernel: tpu_custom_call.1
= control target key start
LH: loop header
LB: loop body
LE: loop exit
PB: predicated region body
PF: predicated region fallthrough
CT: control target
= control target key end

     0   :  { %14 = vsyncpa [#allocation3], 0  ;;  %s1495_s0 = inlined_call_operand.hbm [shape: f32[24,288], index: 0, kind: input, shape index: {}]   ;;  %s1496_s1 = inlined_call_operand.hbm [shape: bf16[288,384], index: 1, kind: input, shape index: {}]   ;;  %s1497_s2 = inlined_call_operand.vmem [shape: f32[1,384], index: 2, kind: input, shape index: {}]   ;;  %s1498_s3 = inlined_call_operand.vmem [shape: f32[8,32], index: 3, kind: input, shape index: {}]   ;;  %s1499_s4 = inlined_call_operand.vmem [shape: f32[34,16], index: 4, kind: input, shape index: {}]   ;;  %s1500_s5 = inlined_call_operand.hbm [shape: f32[24,128], index: 5, kind: output, shape index: {0}]   ;;  %s1501_s6 = inlined_call_operand.hbm [shape: f32[8,128], index: 6, kind: output, shape index: {1}]   ;;  %s1502_s7 = inlined_call_operand.hbm [shape: f32[24,128], index: 7, kind: output, shape index: {2}]   ;;  %s1503_s8 = inlined_call_operand.vmem [shape: f32[2,1], index: 8, kind: output, shape index: {3}]  }
   0x1   :  { %15 = vsyncpa [#allocation6], 0 }
   0x2   :  { %16 = vsyncpa [#allocation4], 0 }
   0x3   :  { %17 = vsyncpa [#allocation9], 0  ;;  %s1327_s27 = smov [#allocation2]  }
   0x4   :  { %s23_s28 = sshll.u32 %s1327_s27, 4  ;;  %s24_s28 = int_to_ptr.vmem [resolvable:$true] %s23_s28 }
   0x5   :  { %s1227_s29 = scalar_lea.vmem %s24_s28, 1152  ;;  %p1232_p1 = scmp.lt.s32.totalorder %s24_s28, %s24_s28 }
   0x6   :  { %p1228_p0 = scmp.ne.s32.totalorder %s24_s28, %s1227_s29  ;;  %p1233_p2 = scmp.lt.s32.totalorder %s1227_s29, %s1227_s29 }
   0x8   :  { %p1234_p3 = por %p1233_p2, %p1232_p1 }
   0xa   :  { %p1235_p4 = pnand %p1234_p3, %p1228_p0 }
   0xc   :  { %1238 = shalt.err (!%p1235_p4)
}
   0xd   :  { %s1328_s30 = smov 384   ;;  %s1329_s9 = smov 24  }
   0xe   :  { %29 = dma.hbm_to_vmem [thread:$0]  %s1495_s0, 1152, %s24_s28, [#allocation3], %s1328_s30, %s1328_s30, %s1329_s9  }
   0xf   :  { %s1330_s12 = smov [#allocation5]  }
  0x10   :  { %s35_s13 = sshll.u32 %s1330_s12, 4  ;;  %s36_s13 = int_to_ptr.vmem [resolvable:$true] %s35_s13 }
  0x11   :  { %s1247_s14 = scalar_lea.vmem %s36_s13, 6912  ;;  %p1252_p6 = scmp.lt.s32.totalorder %s36_s13, %s36_s13 }
  0x12   :  { %p1248_p5 = scmp.ne.s32.totalorder %s36_s13, %s1247_s14  ;;  %p1253_p7 = scmp.lt.s32.totalorder %s1247_s14, %s1247_s14 }
  0x14   :  { %p1254_p8 = por %p1253_p7, %p1252_p6 }
  0x16   :  { %p1255_p9 = pnand %p1254_p8, %p1248_p5 }
  0x18   :  { %1258 = shalt.err (!%p1255_p9)
}
  0x19   :  { %s1331_s15 = smov 192   ;;  %s1332_s16 = smov 12  }
  0x1a   :  { %41 = dma.hbm_to_vmem [thread:$0]  %s1496_s1, 6912, %s36_s13, [#allocation6], %s1331_s15, %s1331_s15, %s1332_s16  }
  0x1b   :  { %1319 = dma.done.wait [#allocation3], 1152  }
  0x1c   :  { %1320 = vsyncadd [#allocation3], 4294966144 }
  0x1d   :  { %1321 = dma.done.wait [#allocation6], 6912  }
  0x1e   :  { %1322 = vsyncadd [#allocation6], 4294960384  ;;  %v1333_v0 = vmov 0   ;;  %v1143_v1 = vld [vmem:[#allocation5 + $0xac] ss:$12 sps:$4 sm:$0xff]   ;;  %v60_v21 = vld [vmem:[#allocation2 + $0x28] sm:$0xff] }
  0x1f   :  { %537 = vmatprep.mubr.bf16.mxu1 %v1333_v0  ;;  %v1145_v2 = vld [vmem:[#allocation5 + $0xa8] ss:$12 sps:$4 sm:$0xff]   ;;  %454 = vmatprep.subr.bf16.mxu0 %v1143_v1  ;;  %v1148_v4 = vld [vmem:[#allocation5 + $0x90] ss:$12 sps:$4 sm:$0xff]   ;;  %v1151_v6 = vld [vmem:[#allocation5 + $0x78] ss:$12 sps:$4 sm:$0xff]  }
  0x20   :  { %v1146_v3 = vld [vmem:[#allocation5 + $0x94] ss:$12 sps:$4 sm:$0xff]   ;;  %455 = vmatpush1.bf16.msra.mxu0 %v1145_v2  ;;  %v1149_v5 = vld [vmem:[#allocation5 + $0x7c] ss:$12 sps:$4 sm:$0xff]   ;;  %v1152_v7 = vld [vmem:[#allocation5 + $0x64] ss:$12 sps:$4 sm:$0xff]  }
  0x21   :  { %456 = vmatprep.subr.bf16.mxu0 %v1146_v3  ;;  %v1154_v8 = vld [vmem:[#allocation5 + $0x60] ss:$12 sps:$4 sm:$0xff]   ;;  %v1157_v10 = vld [vmem:[#allocation5 + $0x48] ss:$12 sps:$4 sm:$0xff]   ;;  %v1160_v12 = vld [vmem:[#allocation5 + $0x30] ss:$12 sps:$4 sm:$0xff]  }
  0x22   :  { %v1155_v9 = vld [vmem:[#allocation5 + $0x4c] ss:$12 sps:$4 sm:$0xff]   ;;  %v1158_v11 = vld [vmem:[#allocation5 + $0x34] ss:$12 sps:$4 sm:$0xff]   ;;  %v1184_v13 = vld [vmem:[#allocation5 + $0x19c] ss:$12 sps:$4 sm:$0xff]  }
  0x23   :  { %v1187_v14 = vld [vmem:[#allocation5 + $0x198] ss:$12 sps:$4 sm:$0xff]   ;;  %v1161_v15 = vld [vmem:[#allocation5 + $0x1c] ss:$12 sps:$4 sm:$0xff]   ;;  %517 = vmatprep.subr.bf16.mxu1 %v1184_v13  ;;  %v1193_v17 = vld [vmem:[#allocation5 + $0x180] ss:$12 sps:$4 sm:$0xff]  }
  0x24   :  { %457 = vmatpush1.bf16.msra.mxu0 %v1148_v4  ;;  %v1190_v16 = vld [vmem:[#allocation5 + $0x184] ss:$12 sps:$4 sm:$0xff]   ;;  %518 = vmatpush1.bf16.msra.mxu1 %v1187_v14  ;;  %v57_v19 = vld [vmem:[#allocation2 + $0x10] sm:$0xff]  ;;  %v59_v24 = vld [vmem:[#allocation2 + $0x20] sm:$0xff]  ;;  %vm447_vm0 = vcmask 261120   ;;  %vm1335_vm1 = vmmov 0  }
  0x25   :  { %458 = vmatprep.subr.bf16.mxu0 %v1149_v5  ;;  %v1163_v18 = vld [vmem:[#allocation5 + $0x18] ss:$12 sps:$4 sm:$0xff]   ;;  %519 = vmatprep.subr.bf16.mxu1 %v1190_v16  ;;  %v1392_v23 = vpack.c.bf16 %v60_v21, %v57_v19  ;;  %v1166_v25 = vld [vmem:[#allocation5] ss:$12 sps:$4 sm:$0xff]   ;;  %v1197_v28 = vld [vmem:[#allocation5 + $0x170] ss:$12 sps:$4 sm:$0xff]  }
  0x26   :  { %v1164_v20 = vld [vmem:[#allocation5 + $0x4] ss:$12 sps:$4 sm:$0xff]   ;;  %v1167_v26 = vld [vmem:[#allocation5 + $0x16c] ss:$12 sps:$4 sm:$0xff]   ;;  %v1169_v31 = vld [vmem:[#allocation5 + $0x168] ss:$12 sps:$4 sm:$0xff]  }
  0x27   :  { %v56_v22 = vld [vmem:[#allocation2 + $0x8] sm:$0xff]  ;;  %v63_v29 = vld [vmem:[#allocation2 + $0x40] sm:$0xff]  ;;  %v1203_v39 = vld [vmem:[#allocation5 + $0x128] ss:$12 sps:$4 sm:$0xff]   ;;  %vm670_vm5 = vcmask 195584   ;;  %vm857_vm10 = vcmask 64512  }
  0x28   :  { %459 = vmatpush1.bf16.msra.mxu0 %v1151_v6  ;;  %520 = vmatpush1.bf16.msra.mxu1 %v1193_v17  ;;  %v65_v27 = vpack.c.bf16 %v59_v24, %v56_v22  ;;  %v1198_v30 = vld [vmem:[#allocation5 + $0xb0] ss:$12 sps:$4 sm:$0xff]   ;;  %v1199_v32 = vld [vmem:[#allocation5 + $0x158] ss:$12 sps:$4 sm:$0xff]   ;;  %v1201_v34 = vld [vmem:[#allocation5 + $0x140] ss:$12 sps:$4 sm:$0xff]   ;;  %v1396_v37 = vpack.c.bf16 %v63_v29, %v63_v29 }
  0x29   :  { %460 = vmatprep.subr.bf16.mxu0 %v1152_v7  ;;  %1053 = vmatprep.subr.bf16.mxu1 %v1197_v28  ;;  %v1200_v33 = vld [vmem:[#allocation5 + $0x98] ss:$12 sps:$4 sm:$0xff]   ;;  %v1170_v35 = vld [vmem:[#allocation5 + $0x154] ss:$12 sps:$4 sm:$0xff]   ;;  %v1172_v36 = vld [vmem:[#allocation5 + $0x150] ss:$12 sps:$4 sm:$0xff]  }
  0x2a   :  { %486 = vmatprep.mubr.bf16.mxu0 %v65_v27  ;;  %v1202_v38 = vld [vmem:[#allocation5 + $0x80] ss:$12 sps:$4 sm:$0xff]   ;;  %v1173_v40 = vld [vmem:[#allocation5 + $0x13c] ss:$12 sps:$4 sm:$0xff]   ;;  %v1175_v41 = vld [vmem:[#allocation5 + $0x138] ss:$12 sps:$4 sm:$0xff]  }
  0x2b   :  { %1043 = vmatmul.mubr.msk.bf16.vlgmr.msra.gmra.mxu1 %vm447_vm0, %v1392_v23  ;;  %v1204_v42 = vld [vmem:[#allocation5 + $0x68] ss:$12 sps:$4 sm:$0xff]   ;;  %v1205_v43 = vld [vmem:[#allocation5 + $0x110] ss:$12 sps:$4 sm:$0xff]   ;;  %v1178_v45 = vld [vmem:[#allocation5 + $0x120] ss:$12 sps:$4 sm:$0xff]  }
  0x2c   :  { %461 = vmatpush1.bf16.msra.mxu0 %v1154_v8  ;;  %547 = vmatprep.mubr.bf16.mxu1 %v1333_v0  ;;  %v1176_v44 = vld [vmem:[#allocation5 + $0x124] ss:$12 sps:$4 sm:$0xff]   ;;  %v1179_v48 = vld [vmem:[#allocation5 + $0x10c] ss:$12 sps:$4 sm:$0xff]   ;;  %v1181_v50 = vld [vmem:[#allocation5 + $0x108] ss:$12 sps:$4 sm:$0xff]  }
  0x2d   :  { %462 = vmatprep.subr.bf16.mxu0 %v1155_v9  ;;  %1054 = vmatpush3.bf16.msra.mxu1 %v1198_v30  ;;  %v1206_v46 = vld [vmem:[#allocation5 + $0x50] ss:$12 sps:$4 sm:$0xff]   ;;  %v1207_v47 = vld [vmem:[#allocation5 + $0xf8] ss:$12 sps:$4 sm:$0xff]   ;;  %v1209_v51 = vld [vmem:[#allocation5 + $0xe0] ss:$12 sps:$4 sm:$0xff]  }
  0x2e   :  { %1055 = vmatprep.subr.bf16.mxu1 %v1199_v32  ;;  %v1208_v49 = vld [vmem:[#allocation5 + $0x38] ss:$12 sps:$4 sm:$0xff]   ;;  %v1182_v52 = vld [vmem:[#allocation5 + $0xf4] ss:$12 sps:$4 sm:$0xff]   ;;  %v1186_v54 = vld [vmem:[#allocation5 + $0xf0] ss:$12 sps:$4 sm:$0xff]  }
  0x2f   :  { %v1210_v53 = vld [vmem:[#allocation5 + $0x20] ss:$12 sps:$4 sm:$0xff]   ;;  %v1211_v55 = vld [vmem:[#allocation5 + $0xc8] ss:$12 sps:$4 sm:$0xff]   ;;  %v1192_v58 = vld [vmem:[#allocation5 + $0xd8] ss:$12 sps:$4 sm:$0xff]  }
  0x30   :  { %463 = vmatpush1.bf16.msra.mxu0 %v1157_v10  ;;  %v1188_v56 = vld [vmem:[#allocation5 + $0xdc] ss:$12 sps:$4 sm:$0xff]   ;;  %v1213_v59 = vld [vmem:[#allocation5 + $0x1a0] ss:$12 sps:$4 sm:$0xff]   ;;  %v1194_v60 = vld [vmem:[#allocation5 + $0xc4] ss:$12 sps:$4 sm:$0xff]  }
  0x31   :  { %464 = vmatprep.subr.bf16.mxu0 %v1158_v11  ;;  %1056 = vmatpush3.bf16.msra.mxu1 %v1200_v33  ;;  %v1212_v57 = vld [vmem:[#allocation5 + $0x8] ss:$12 sps:$4 sm:$0xff]   ;;  %v55_v61 = vld [vmem:[#allocation2] sm:$0xff]  ;;  %v1196_v0 = vld [vmem:[#allocation5 + $0xc0] ss:$12 sps:$4 sm:$0xff]   ;;  %v1334_v6 = vmov 0.0  }
  0x32   :  { %1057 = vmatprep.subr.bf16.mxu1 %v1201_v34  ;;  %v58_v62 = vld [vmem:[#allocation2 + $0x18] sm:$0xff]  ;;  %v61_v4 = vld [vmem:[#allocation2 + $0x30] sm:$0xff]  ;;  %vm931_vm11 = vcmask 123904   ;;  %s1337_s30 = smov [#allocation7]  }
  0x33   :  { %1044 = vmatmul.mubr.msk.bf16.gmra.mxu1 %vm447_vm0, %v1396_v37  ;;  %v62_v63 = vld [vmem:[#allocation2 + $0x38] sm:$0xff]  ;;  %v64_v1 = vpack.c.bf16 %v58_v62, %v55_v61  ;;  %v67_v5 = vpack.c.bf16 %v61_v4, %v61_v4  ;;  %s943_s9 = sshll.u32 %s1337_s30, 4  ;;  %s944_s9 = int_to_ptr.vmem [resolvable:$true] %s943_s9 }
  0x34   :  { %465 = vmatpush1.bf16.msra.mxu0 %v1160_v12  ;;  %588 = vmatprep.mubr.bf16.mxu1 %v65_v27  ;;  %v1214_v2 = vld [vmem:[#allocation5 + $0x188] ss:$12 sps:$4 sm:$0xff]   ;;  %v68_v3 = vpack.c.bf16 %v62_v63, %v62_v63 }
  0x35   :  { %466 = vmatprep.subr.bf16.mxu0 %v1161_v15  ;;  %1058 = vmatpush3.bf16.msra.mxu1 %v1202_v38  ;;  %v144_v15 = vlaneseq }
  0x36   :  { %1059 = vmatprep.subr.bf16.mxu1 %v1203_v39 }
  0x37   :  { %v1409_v16 = vshrl.u32 %v144_v15, 7  ;;  %v1422_v34 = vand.u32 127, %v144_v15 }
  0x38   :  { %467 = vmatpush1.bf16.msra.mxu0 %v1163_v18  ;;  %v142_v18 = vld [vmem:[%s1497_s2] sm:$0x7] }
  0x39   :  { %468 = vmatprep.subr.bf16.mxu0 %v1164_v20  ;;  %1060 = vmatpush3.bf16.msra.mxu1 %v1204_v42  ;;  %v146_v17 = vsub.s32 0, %v1409_v16  ;;  %v154_v27 = vsub.s32 2, %v1409_v16  ;;  %v1419_v29 = vadd.s32 1, %v1409_v16  ;;  %v150_v32 = vsub.s32 1, %v1409_v16 }
  0x3a   :  { %1061 = vmatprep.subr.bf16.mxu1 %v1205_v43 }
  0x3b   :  { %v147_v20 = vrot.slane %v142_v18, %v146_v17  ;;  %v665_v42 = vmul.u32 3, %v1419_v29 }
  0x3c   :  { %469 = vmatpush1.bf16.msra.mxu0 %v1166_v25 }
  0x3d   :  { %470 = vmatprep.subr.bf16.mxu0 %v1167_v26  ;;  %1062 = vmatpush3.bf16.msra.mxu1 %v1206_v46  ;;  %v151_v46 = vrot.slane %v142_v18, %v150_v32  ;;  %vm1434_vm3 = vcmp.lt.s32.totalorder %v1422_v34, %v665_v42 }
  0x3e   :  { %1063 = vmatprep.subr.bf16.mxu1 %v1207_v47 }
  0x40   :  { %471 = vmatpush2.bf16.msra.mxu0 %v1169_v31 }
  0x41   :  { %472 = vmatprep.subr.bf16.mxu0 %v1170_v35  ;;  %1064 = vmatpush3.bf16.msra.mxu1 %v1208_v49 }
  0x42   :  { %1065 = vmatprep.subr.bf16.mxu1 %v1209_v51 }
  0x44   :  { %473 = vmatpush2.bf16.msra.mxu0 %v1172_v36 }
  0x45   :  { %474 = vmatprep.subr.bf16.mxu0 %v1173_v40  ;;  %1066 = vmatpush3.bf16.msra.mxu1 %v1210_v53  ;;  %v155_v40 = vrot.slane %v142_v18, %v154_v27 }
  0x46   :  { %1067 = vmatprep.subr.bf16.mxu1 %v1211_v55 }
  0x48   :  { %475 = vmatpush2.bf16.msra.mxu0 %v1175_v41 }
  0x49   :  { %476 = vmatprep.subr.bf16.mxu0 %v1176_v44  ;;  %1068 = vmatpush3.bf16.msra.mxu1 %v1212_v57 }
  0x4a   :  { %1096 = vmatprep.subr.bf16.mxu1 %v1213_v59 }
  0x4c   :  { %477 = vmatpush2.bf16.msra.mxu0 %v1178_v45  ;;  %589 = vmatmul.mubr.bf16.vlgmr.msra.gmra.mxu1 %v64_v1 }
  0x4d   :  { %478 = vmatprep.subr.bf16.mxu0 %v1179_v48  ;;  %596 = vmatprep.mubr.bf16.mxu1 %v68_v3 }
  0x4e   :  { %1097 = vmatpush3.bf16.msra.mxu1 %v1213_v59 }
  0x4f   :  { %1098 = vmatprep.subr.bf16.mxu1 %v1214_v2 }
  0x50   :  { %479 = vmatpush2.bf16.msra.mxu0 %v1181_v50 }
  0x51   :  { %480 = vmatprep.subr.bf16.mxu0 %v1182_v52 }
  0x52   :  { %1099 = vmatpush3.bf16.msra.mxu1 %v1214_v2 }
  0x53   :  { %1104 = vmatprep.subr.mxu1 %v1334_v6 }
  0x54   :  { %481 = vmatpush2.bf16.msra.mxu0 %v1186_v54  ;;  %597 = vmatmul.mubr.bf16.gmra.mxu1 %v67_v5 }
  0x55   :  { %482 = vmatprep.subr.bf16.mxu0 %v1188_v56  ;;  %1100 = vmatprep.mubr.msk.bf16.mxu1 %vm447_vm0, %v1392_v23 }
  0x58   :  { %483 = vmatpush2.bf16.msra.mxu0 %v1192_v58 }
  0x59   :  { %484 = vmatprep.subr.bf16.mxu0 %v1194_v60 }
  0x5c   :  { %485 = vmatpush2.bf16.msra.mxu0 %v1196_v0  ;;  %1101 = vmatmul.mubr.msk.bf16.vlgmr.msra.gmra.mxu1 %vm447_vm0, %v1396_v37  ;;  %v662_v37 = vmul.u32 3, %v1409_v16 }
  0x5d   :  { %1110 = vmatprep.mubr.msk.f32.mxu1 %vm1335_vm1, %v1334_v6 }
  0x5e   :  { %vm1429_vm2 = vcmp.ge.s32.totalorder %v1422_v34, %v662_v37 }
  0x5f   :  { %487 = vmatmul.mubr.bf16.vlgmr.msra.gmra.mxu0 %v64_v1  ;;  %vm667_vm4 = vmand %vm1429_vm2, %vm1434_vm3 }
  0x60   :  { %496 = vmatprep.mubr.bf16.mxu0 %v68_v3 }
  0x67   :  { %497 = vmatmul.mubr.bf16.gmra.mxu0 %v67_v5  ;;  %v1047_v5 = vsel %vm667_vm4, 1.0, %v1334_v6 }
  0xeb   :  { %v539_v7 = vpop.f32.mrf.mxu1 }
  0xed   :  { %v1407_v8 = vpop.f32.mrf.mxu1 }
  0xef   :  { %v543_v9 = vpop.f32.mrf.mxu1 }
  0xf1   :  { %v545_v10 = vpop.f32.mrf.mxu1 }
  0xf3   :  { %v549_v11 = vpop.f32.mrf.mxu1 }
  0xf5   :  { %v551_v12 = vpop.f32.mrf.mxu1 }
  0xf7   :  { %v553_v13 = vpop.f32.mrf.mxu1 }
  0xf8   :  { %v751_v13 = vld [vmem:[%s1498_s3] sm:$0xff]  ;;  %s1336_s3 = smov [#allocation8]  }
  0xf9   :  { %v554_v14 = vpop.f32.mrf.mxu1 }
 0x10c   :  { %v1069_v19 = vpop.f32.mrf.mxu1 }
 0x10e   :  { %v1070_v21 = vpop.f32.mrf.mxu1 }
 0x10f   :  { %v1071_v38 = vadd.f32 %v1070_v21, %v1069_v19  ;;  %v750_v19 = vld [vmem:[%s1499_s4 + $0x20] sm:$0x3] }
 0x110   :  { %v1072_v22 = vpop.f32.mrf.mxu1  ;;  %v848_v42 = vrot.slane %v750_v19, %v150_v32 }
 0x111   :  { %v591_v52 = vadd.f32 %v1071_v38, %v155_v40 }
 0x112   :  { %v1073_v25 = vpop.f32.mrf.mxu1 }
 0x113   :  { %v1074_v51 = vadd.f32 %v1073_v25, %v1072_v22 }
 0x114   :  { %v1075_v30 = vpop.f32.mrf.mxu1 }
 0x115   :  { %v594_v1 = vadd.f32 %v1074_v51, %v155_v40 }
 0x116   :  { %v1076_v35 = vpop.f32.mrf.mxu1 }
 0x117   :  { %v1077_v39 = vadd.f32 %v1076_v35, %v1075_v30  ;;  %v850_v35 = vmul.u32 4, %v1409_v16 }
 0x118   :  { %v1078_v43 = vpop.f32.mrf.mxu1 }
 0x119   :  { %v599_v45 = vadd.f32 %v1077_v39, %v155_v40  ;;  %vm851_vm7 = vcmp.ge.s32.totalorder %v1422_v34, %v850_v35 }
 0x11a   :  { %v1079_v48 = vpop.f32.mrf.mxu1 }
 0x11c   :  { %v1102_v57 = vpop.f32.mrf.mxu1 }
 0x11d   :  { %v647_v59 = vadd.f32 %v1102_v57, %v599_v45 }
 0x11e   :  { %v638_v62 = vpop.f32.mrf.mxu1 }
 0x11f   :  { %v488_v23 = vpop.f32.mrf.mxu0  ;;  %657 = vst [vmem:[#allocation10 + $0x10] sm:$0xff] %v647_v59  ;;  %v639_v0 = vadd.f32 %v638_v62, %v591_v52 }
 0x120   :  { %v489_v24 = vadd.f32 %v488_v23, %v147_v20  ;;  %v1103_v3 = vpop.f32.mrf.mxu1 }
 0x121   :  { %v490_v26 = vpop.f32.mrf.mxu0  ;;  %655 = vst [vmem:[#allocation10] sm:$0xff] %v639_v0 }
 0x122   :  { %v540_v28 = vadd.f32 %v539_v7, %v489_v24  ;;  %v491_v60 = vadd.f32 %v490_v26, %v151_v46  ;;  %v641_v7 = vpop.f32.mrf.mxu1 }
 0x123   :  { %v492_v31 = vpop.f32.mrf.mxu0 }
 0x124   :  { %652 = vst [vmem:[#allocation7] sm:$0xff] %v540_v28  ;;  %v493_v33 = vadd.f32 %v492_v31, %v147_v20  ;;  %v542_v4 = vadd.f32 %v1407_v8, %v491_v60  ;;  %v748_v8 = vld [vmem:[%s1499_s4 + $0x10] sm:$0xff] }
 0x125   :  { %v494_v36 = vpop.f32.mrf.mxu0 }
 0x126   :  { %v544_v41 = vadd.f32 %v543_v9, %v493_v33  ;;  %v495_v53 = vadd.f32 %v494_v36, %v151_v46  ;;  %v749_v9 = vld [vmem:[%s1499_s4 + $0x18] sm:$0xff]  ;;  %v852_v36 = vmul.u32 4, %v1419_v29 }
 0x127   :  { %v498_v44 = vpop.f32.mrf.mxu0 }
 0x128   :  { %653 = vst [vmem:[#allocation7 + $0x8] sm:$0xff] %v544_v41  ;;  %v499_v47 = vadd.f32 %v498_v44, %v147_v20  ;;  %v546_v2 = vadd.f32 %v545_v10, %v495_v53  ;;  %v747_v10 = vld [vmem:[%s1499_s4 + $0x8] sm:$0xff]  ;;  %v755_v20 = vrot.slane %v750_v19, %v146_v17  ;;  %vm853_vm8 = vcmp.lt.s32.totalorder %v1422_v34, %v852_v36 }
 0x129   :  { %v500_v49 = vpop.f32.mrf.mxu0  ;;  %vm854_vm9 = vmand %vm851_vm7, %vm853_vm8 }
 0x12a   :  { %v550_v54 = vadd.f32 %v549_v11, %v499_v47  ;;  %v501_v55 = vadd.f32 %v500_v49, %v151_v46  ;;  %v642_v11 = vadd.f32 %v641_v7, %v594_v1  ;;  %v1051_v45 = vsel %vm854_vm9, 1.0, %v1334_v6 }
 0x12b   :  { %v502_v58 = vpop.f32.mrf.mxu0 }
 0x12c   :  { %654 = vst [vmem:[#allocation7 + $0x10] sm:$0xff] %v550_v54  ;;  %v552_v61 = vadd.f32 %v551_v12, %v501_v55  ;;  %656 = vst [vmem:[#allocation10 + $0x8] sm:$0xff] %v642_v11  ;;  %v746_v12 = vld [vmem:[%s1499_s4] sm:$0xff]  ;;  %s956_s4 = sshll.u32 %s1336_s3, 4  ;;  %s957_s4 = int_to_ptr.vmem [resolvable:$true] %s956_s4 }
 0x12d   :  { %v503_v63 = vpop.f32.mrf.mxu0  ;;  %s1259_s10 = scalar_lea.vmem %s957_s4, 128  ;;  %p1264_p11 = scmp.lt.s32.totalorder %s957_s4, %s957_s4 }
 0x12e   :  { %1105 = vmatpush3.msra.mxu1 %v552_v61  ;;  %p1260_p10 = scmp.ne.s32.totalorder %s957_s4, %s1259_s10  ;;  %p1265_p12 = scmp.lt.s32.totalorder %s1259_s10, %s1259_s10 }
 0x12f   :  { %1106 = vmatprep.subr.mxu1 %v1334_v6 }
 0x130   :  { %1107 = vmatpush3.msra.mxu1 %v546_v2  ;;  %p1266_p13 = por %p1265_p12, %p1264_p11 }
 0x131   :  { %1108 = vmatprep.subr.mxu1 %v1334_v6 }
 0x132   :  { %1109 = vmatpush3.msra.mxu1 %v542_v4  ;;  %p1267_p0 = pnand %p1266_p13, %p1260_p10 }
 0x133   :  { %1111 = vmatmul.mubr.msk.f32.vlgmr.msra.gmra.mxu1 %vm670_vm5, %v1047_v5  ;;  %1113 = vmatprep.subr.mxu1 %v1334_v6 }
 0x134   :  { %1114 = vmatpush3.msra.mxu1 %v749_v9  ;;  %1121 = vmatprep.mubr.msk.f32.mxu1 %vm1335_vm1, %v1334_v6 }
 0x135   :  { %1115 = vmatprep.subr.mxu1 %v1334_v6 }
 0x136   :  { %1116 = vmatpush3.msra.mxu1 %v748_v8 }
 0x137   :  { %1117 = vmatprep.subr.mxu1 %v1334_v6 }
 0x138   :  { %1118 = vmatpush3.msra.mxu1 %v747_v10 }
 0x139   :  { %1119 = vmatprep.subr.mxu1 %v1334_v6 }
 0x13a   :  { %1120 = vmatpush3.msra.mxu1 %v746_v12 }
 0x13b   :  { %1122 = vmatmul.mubr.msk.f32.vlgmr.msra.gmra.mxu1 %vm447_vm0, %v751_v13  ;;  %1124 = vmatprep.subr.mxu1 %v1334_v6 }
 0x13c   :  { %1126 = vmatprep.mubr.msk.f32.mxu1 %vm1335_vm1, %v1334_v6 }
 0x1f3   :  { %v740_v14 = vpop.f32.mrf.mxu1 }
 0x1f4   :  { %v744_v15 = vmul.f32 0.33333334, %v740_v14 }
 0x1f5   :  { %v1112_v18 = vpop.f32.mrf.mxu1 }
 0x1f6   :  { %745 = vst [vmem:[#allocation8] sm:$0xff] %v744_v15 }
 0x1fb   :  { %v825_v21 = vpop.f32.mrf.mxu1 }
 0x1fc   :  { %v826_v22 = vadd.f32 %v825_v21, %v755_v20 }
 0x1fd   :  { %v1123_v23 = vpop.f32.mrf.mxu1 }
 0x1fe   :  { %v830_v24 = vand.u32 2147483647, %v826_v22  ;;  %v829_v39 = vmax.f32 %v826_v22, 0.0 }
 0x200   :  { %v831_v25 = vsub.f32 0.0, %v830_v24 }
 0x202   :  { %v832_v26 = vmul.f32 1.442695, %v831_v25 }
 0x204   :  { %1215 = vpow2.f32 %v832_v26 }
 0x211   :  { %v1216_v27 = vpop.eup %1215 }
 0x212   :  { %v834_v28 = vadd.f32 1.0, %v1216_v27  ;;  %v837_v30 = vmul.f32 -0.5, %v1216_v27  ;;  %v840_v33 = vand.u32 2147483647, %v1216_v27 }
 0x214   :  { %1217 = vlog2.f32 %v834_v28  ;;  %v838_v31 = vadd.f32 1.0, %v837_v30  ;;  %vm841_vm6 = vcmp.lt.f32.partialorder %v840_v33, 0.0004427343 }
 0x216   :  { %v839_v17 = vmul.f32 %v1216_v27, %v838_v31 }
 0x221   :  { %v1218_v37 = vpop.eup %1217 }
 0x222   :  { %v836_v38 = vmul.f32 0.6931472, %v1218_v37 }
 0x224   :  { %v842_v40 = vsel %vm841_vm6, %v839_v17, %v836_v38 }
 0x225   :  { %v843_v41 = vadd.f32 %v842_v40, %v829_v39 }
 0x227   :  { %v1050_v43 = vadd.f32 -0.6931472, %v843_v41 }
 0x229   :  { %v849_v44 = vmul.f32 %v1050_v43, %v848_v42 }
 0x22b   :  { %1125 = vmatpush3.msra.mxu1 %v849_v44 }
 0x22c   :  { %1127 = vmatmul.mubr.msk.f32.vlgmr.msra.gmra.mxu1 %vm857_vm10, %v1051_v45 }
 0x2ec   :  { %v927_v29 = vpop.f32.mrf.mxu1 }
 0x2ed   :  { %v932_v46 = vsel %vm931_vm11, %v927_v29, 0.0 }
 0x2ee   :  { %v1128_v47 = vpop.f32.mrf.mxu1  ;;  %933 = vadd.xlane.f32.xlu0 %v932_v46 }
 0x2ef   :  { %1270 = shalt.err (!%p1267_p0)
}
 0x2f0   :  { %959 = dma.vmem_to_hbm [thread:$0]  %s957_s4, 128, %s1501_s6, [#allocation9]  }
 0x2f1   :  { %s1279_s13 = scalar_lea.vmem %s944_s9, 384  ;;  %p1284_p2 = scmp.lt.s32.totalorder %s944_s9, %s944_s9 }
 0x2f2   :  { %p1280_p1 = scmp.ne.s32.totalorder %s944_s9, %s1279_s13  ;;  %p1285_p3 = scmp.lt.s32.totalorder %s1279_s13, %s1279_s13 }
 0x2f4   :  { %p1286_p4 = por %p1285_p3, %p1284_p2 }
 0x2f6   :  { %p1287_p5 = pnand %p1286_p4, %p1280_p1 }
 0x2f8   :  { %1290 = shalt.err (!%p1287_p5)
}
 0x2f9   :  { %s1338_s14 = smov 128   ;;  %s1339_s15 = smov 8  }
 0x2fa   :  { %949 = dma.vmem_to_hbm [thread:$0]  %s944_s9, 384, %s1500_s5, [#allocation4], %s1338_s14, %s1338_s14, %s1339_s15  }
 0x2fb   :  { %s1340_s18 = smov [#allocation10]  }
 0x2fc   :  { %s965_s0 = sshll.u32 %s1340_s18, 4  ;;  %s966_s0 = int_to_ptr.vmem [resolvable:$true] %s965_s0 }
 0x2fd   :  { %s1299_s1 = scalar_lea.vmem %s966_s0, 384  ;;  %p1304_p7 = scmp.lt.s32.totalorder %s966_s0, %s966_s0 }
 0x2fe   :  { %p1300_p6 = scmp.ne.s32.totalorder %s966_s0, %s1299_s1  ;;  %p1305_p8 = scmp.lt.s32.totalorder %s1299_s1, %s1299_s1 }
 0x300   :  { %p1306_p9 = por %p1305_p8, %p1304_p7 }
 0x302   :  { %p1307_p10 = pnand %p1306_p9, %p1300_p6 }
 0x304   :  { %1310 = shalt.err (!%p1307_p10)
}
 0x305   :  { %971 = dma.vmem_to_hbm [thread:$0]  %s966_s0, 384, %s1502_s7, [#allocation9], %s1338_s14, %s1338_s14, %s1339_s15   ;;  %vm936_vm12 = vcmask 1024  }
 0x377   :  { %v934_v6 = vpop.xlane.xlu0 %933 }
 0x378   :  { %v935_v16 = vadd.f32 -1.1979812, %v934_v6 }
 0x37a   :  { %937 = vst.msk [vmem:[%s1503_s8] sm:$0x3] %vm936_vm12, %v935_v16 }
 0x37b   :  { %1323 = dma.done.wait [#allocation4], 384  }
 0x37c   :  { %1324 = vsyncadd [#allocation4], 4294966912 }
 0x37d   :  { %1325 = dma.done.wait [#allocation9], 512  }
 0x37e   :  { %1326 = vsyncadd [#allocation9], 4294966784 }
 0x37f   :  { %985 = vsyncpa [#allocation3], 1 }
 0x380   :  { %986 = vsyncpa [#allocation6], 1 }
 0x381   :  { %987 = vsyncpa [#allocation4], 1 }
 0x382   :  { %988 = vsyncpa [#allocation9], 1 }

</bundles_post_ra>
